<compile_context>
chip_gen: v5e
topology: v5e:2x2
jax: 0.10.0
libtpu: 0.0.40
codegen_flags: <defaults>
</compile_context>

<pallas_src>
import math
import functools

import jax
import jax.numpy as jnp
from jax import lax
from jax.experimental import pallas as pl
from jax.experimental.pallas import tpu as pltpu


_MASK_VALUE = -1000000000.0


def _device_kind():
    try:
        return jax.devices()[0].device_kind.lower()
    except Exception:
        return ""


def _vmem_cap_bytes():
    kind = _device_kind()
    if "v7" in kind:
        return 56 * 1024 * 1024          # v7x: 64 MiB per TC, leave headroom
    if ("v5 lite" in kind) or ("v5e" in kind) or ("v6" in kind):
        return 110 * 1024 * 1024         # v5e / v6e: 128 MiB physical VMEM
    return 64 * 1024 * 1024              # unknown generation: conservative


def _pick_tile(s, preferred):
    """Largest preferred tile that divides s, else the full extent (small / odd sizes)."""
    for t in preferred:
        if s % t == 0:
            return t
    return s


def _tiles_for(seq_q, seq_k):
    kind = _device_kind()
    is_v5e = ("v5 lite" in kind) or ("v5e" in kind)
    if is_v5e:                                  # 4x128^2 MXU, small scoped VMEM default
        tq = _pick_tile(seq_q, (128, 256))
        tk = _pick_tile(seq_k, (256, 128))
    else:                                       # v6e / v7x: 2x256^2 MXU
        tq = _pick_tile(seq_q, (256, 128))
        tk = _pick_tile(seq_k, (512, 256, 128))
    return tq, tk


# --------------------------------------------------------------------------------------
# Projection kernel: y = x @ W + b   (used for the K and V projections)
# --------------------------------------------------------------------------------------

def _linear_kernel(x_ref, w_ref, b_ref, o_ref):
    y = jnp.dot(x_ref[0], w_ref[...], preferred_element_type=jnp.float32) + b_ref[...]
    o_ref[0] = y.astype(o_ref.dtype)


def _linear(x, w, bias, out_dtype):
    B, S, M = x.shape
    H = w.shape[1]
    tr = _pick_tile(S, (512, 256, 128))
    cdb = jnp.dtype(x.dtype).itemsize
    odb = jnp.dtype(out_dtype).itemsize
    est = 2 * tr * M * cdb + M * H * cdb + H * 4 + 2 * tr * H * odb
    vmem_limit = int(min(max(2 * est, 32 * 1024 * 1024), _vmem_cap_bytes()))

    return pl.pallas_call(
        _linear_kernel,
        out_shape=jax.ShapeDtypeStruct((B, S, H), out_dtype),
        grid_spec=pltpu.PrefetchScalarGridSpec(
            num_scalar_prefetch=0,
            grid=(B, S // tr),
            in_specs=[
                pl.BlockSpec((1, tr, M), lambda b, r: (b, r, 0)),
                pl.BlockSpec((M, H), lambda b, r: (0, 0),
                             pipeline_mode=pl.Buffered(1)),        # constant index: 1 buffer
                pl.BlockSpec((1, H), lambda b, r: (0, 0),
                             pipeline_mode=pl.Buffered(1)),
            ],
            out_specs=pl.BlockSpec((1, tr, H), lambda b, r: (b, r, 0)),
        ),
        compiler_params=pltpu.CompilerParams(
            dimension_semantics=("parallel", "parallel"),
            vmem_limit_bytes=vmem_limit),
    )(x, w, bias)


# --------------------------------------------------------------------------------------
# Flash-attention kernel (fused q projection + online softmax over streamed K/V tiles)
# --------------------------------------------------------------------------------------

def _flash_attn_kernel(apply_mask, use_attn_mask, scale, tq, tk,
                       q_ref, k_ref, v_ref, *rest):
    if use_attn_mask:
        mask_ref, rest = rest[0], rest[1:]
    else:
        mask_ref = None
    (wq_ref, bq_ref, o_ref, qproj_ref, m_ref, l_ref, acc_ref) = rest

    qi = pl.program_id(1)          # query-tile index (megacore-parallel)
    kv = pl.program_id(2)          # key/value-tile index (innermost reduction axis)
    n_kv = pl.num_programs(2)

    # ---- Project (and pre-scale) this q tile once per (batch, q tile); init softmax state
    @pl.when(kv == 0)
    def _():
        qp = jnp.dot(q_ref[0], wq_ref[...],
                     preferred_element_type=jnp.float32) + bq_ref[...]
        qproj_ref[...] = (qp * scale).astype(qproj_ref.dtype)   # fold 1/sqrt(h_dim) into q
        m_ref[...] = jnp.full(m_ref.shape, -jnp.inf, jnp.float32)
        l_ref[...] = jnp.zeros(l_ref.shape, jnp.float32)
        acc_ref[...] = jnp.zeros(acc_ref.shape, jnp.float32)

    def update():
        k_tile = k_ref[0]                                         # (TK, H) projected K
        v_tile = v_ref[0]                                         # (TK, H) projected V
        # (TQ, H) x (TK, H) contracting H of both operands -> no explicit k.T
        s = lax.dot_general(qproj_ref[...], k_tile,
                            dimension_numbers=(((1,), (1,)), ((), ())),
                            preferred_element_type=jnp.float32)   # (TQ, TK) f32

        keep = None
        if use_attn_mask:
            kv_start = pl.multiple_of(kv * tk, tk)
            keep = mask_ref[0, :, pl.ds(kv_start, tk)] > 0.0      # (1, TK) -> broadcast rows
        if apply_mask:
            row = qi * tq + lax.broadcasted_iota(jnp.int32, s.shape, 0)
            col = kv * tk + lax.broadcasted_iota(jnp.int32, s.shape, 1)
            causal = col <= row
            keep = causal if keep is None else jnp.logical_and(keep, causal)
        if keep is not None:
            s = jnp.where(keep, s, _MASK_VALUE)

        # ---- Online softmax update (all f32) ----
        m_prev = m_ref[...]
        m_new = jnp.maximum(m_prev, jnp.max(s, axis=-1, keepdims=True))
        alpha = jnp.exp(m_prev - m_new)
        p = jnp.exp(s - m_new)
        l_ref[...] = alpha * l_ref[...] + jnp.sum(p, axis=-1, keepdims=True)
        acc_ref[...] = alpha * acc_ref[...] + jnp.dot(
            p.astype(v_tile.dtype), v_tile, preferred_element_type=jnp.float32)
        m_ref[...] = m_new

    if apply_mask:
        # Causal: skip kv tiles that are entirely above the diagonal (fully masked).
        # Note: the kv == 0 tile always contributes, so the accumulators are always valid.
        @pl.when(kv * tk <= qi * tq + (tq - 1))
        def _():
            update()
    else:
        update()

    # ---- Finalize: normalize with an exact divide (once per q tile) and store ----
    @pl.when(kv == n_kv - 1)
    def _():
        inv_l = 1.0 / l_ref[...]
        o_ref[0] = (acc_ref[...] * inv_l).astype(o_ref.dtype)
        # TODO(synk): nn.Dropout(p=0.1) is identity in eval mode; training-mode dropout
        # (torch RNG semantics) is not reproduced here.


def attention_forward(q, k, v, params, attention_mask=None, apply_mask=False,
                      compute_dtype=jnp.bfloat16, out_dtype=jnp.float32):
    """Pallas forward pass equivalent to Attention.forward (eval mode).

    compute_dtype: dtype of the MXU matmul operands (bf16 default -> full MXU throughput
    on v5e/v6e/v7x); accumulation and softmax math are always f32.
    out_dtype: dtype of the returned attention output (f32 matches the torch module).
    """
    B, Sq, M = q.shape
    _, Sk, _ = k.shape
    wq, bq, wk, bk, wv, bv = params
    H = wq.shape[1]
    scale = 1.0 / math.sqrt(H)

    cd = compute_dtype
    cdb = jnp.dtype(cd).itemsize
    odb = jnp.dtype(out_dtype).itemsize

    q_c = q.astype(cd)
    wq_c, wk_c, wv_c = (w.astype(cd) for w in (wq, wk, wv))
    bq_f, bk_f, bv_f = (b.astype(jnp.float32) for b in (bq, bk, bv))

    # K / V projections as separate tiled Pallas GEMMs -> the attention kernel streams
    # projected tiles (VMEM is O(tile), not O(Sk)), and the q axis can be megacore-parallel.
    k_proj = _linear(k.astype(cd), wk_c, bk_f, cd)
    v_proj = _linear(v.astype(cd), wv_c, bv_f, cd)

    tq, tk = _tiles_for(Sq, Sk)
    n_q = Sq // tq
    n_kv = Sk // tk

    use_attn_mask = attention_mask is not None

    in_specs = [
        pl.BlockSpec((1, tq, M), lambda b, qi, kv: (b, qi, 0)),   # raw q tile
        pl.BlockSpec((1, tk, H), lambda b, qi, kv: (b, kv, 0)),   # projected K tile
        pl.BlockSpec((1, tk, H), lambda b, qi, kv: (b, kv, 0)),   # projected V tile
    ]
    inputs = [q_c, k_proj, v_proj]
    if use_attn_mask:
        mask3 = attention_mask.astype(jnp.float32).reshape(B, 1, Sk)
        in_specs.append(pl.BlockSpec((1, 1, Sk), lambda b, qi, kv: (b, 0, 0)))  # per batch
        inputs.append(mask3)
    in_specs += [
        pl.BlockSpec((M, H), lambda b, qi, kv: (0, 0),
                     pipeline_mode=pl.Buffered(1)),               # Wq: constant index
        pl.BlockSpec((1, H), lambda b, qi, kv: (0, 0),
                     pipeline_mode=pl.Buffered(1)),               # bq: constant index
    ]
    inputs += [wq_c, bq_f]

    out_spec = pl.BlockSpec((1, tq, H), lambda b, qi, kv: (b, qi, 0))

    scratch_shapes = [
        pltpu.VMEM((tq, H), cd),            # projected, pre-scaled q tile
        pltpu.VMEM((tq, 1), jnp.float32),   # running max m
        pltpu.VMEM((tq, 1), jnp.float32),   # running denom l
        pltpu.VMEM((tq, H), jnp.float32),   # output accumulator
    ]

    est = (2 * tq * M * cdb                         # q tiles (double buffered)
           + 4 * tk * H * cdb                       # K/V tiles (double buffered)
           + (2 * Sk * 4 if use_attn_mask else 0)   # mask block
           + M * H * cdb + H * 4                    # Wq / bq (single buffered)
           + 2 * tq * H * odb                       # output tiles
           + tq * H * cdb + 2 * tq * 4 + tq * H * 4)  # scratch
    vmem_limit = int(min(max(2 * est, 32 * 1024 * 1024), _vmem_cap_bytes()))

    kernel = functools.partial(_flash_attn_kernel, apply_mask, use_attn_mask,
                               scale, tq, tk)

    return pl.pallas_call(
        kernel,
        out_shape=jax.ShapeDtypeStruct((B, Sq, H), out_dtype),
        grid_spec=pltpu.PrefetchScalarGridSpec(
            num_scalar_prefetch=0,
            grid=(B, n_q, n_kv),
            in_specs=in_specs,
            out_specs=out_spec,
            scratch_shapes=scratch_shapes,
        ),
        compiler_params=pltpu.CompilerParams(
            dimension_semantics=("parallel", "parallel", "arbitrary"),
            vmem_limit_bytes=vmem_limit),
    )(*inputs)


# --------------------------------------------------------------------------------------
# Parameters, reference and self-test
# --------------------------------------------------------------------------------------

def init_params(key, m_dim, h_dim):
    """Deterministic parameter init matching nn.Linear(m_dim, h_dim) shapes.

    Weights stored as (m_dim, h_dim) == torch weight (h_dim, m_dim) transposed, so the
    kernel computes x @ W + b == torch's x @ W_t.T + b.
    """
    keys = jax.random.split(key, 6)
    bound = 1.0 / math.sqrt(m_dim)

    def u(kk, shape):
        return jax.random.uniform(kk, shape, jnp.float32, -bound, bound)

    wq = u(keys[0], (m_dim, h_dim)); bq = u(keys[1], (1, h_dim))
    wk = u(keys[2], (m_dim, h_dim)); bk = u(keys[3], (1, h_dim))
    wv = u(keys[4], (m_dim, h_dim)); bv = u(keys[5], (1, h_dim))
    return (wq, bq, wk, bk, wv, bv)


def _reference(q, k, v, params, attention_mask, apply_mask):
    """Plain-JAX f32 reference mirroring the torch forward (eval mode)."""
    wq, bq, wk, bk, wv, bv = params
    qp = q @ wq + bq
    kp = k @ wk + bk
    vp = v @ wv + bv
    h_dim = wq.shape[1]
    out = jnp.einsum("bqh,bkh->bqk", qp, kp) / math.sqrt(h_dim)
    if attention_mask is not None:
        keep = attention_mask[:, None, :] > 0
        out = jnp.where(keep, out, _MASK_VALUE)
    if apply_mask:
        sq, sk = out.shape[1], out.shape[2]
        causal = jnp.tril(jnp.ones((sq, sk), dtype=bool))
        out = jnp.where(causal[None], out, _MASK_VALUE)
    out = jax.nn.softmax(out, axis=-1)
    return jnp.einsum("bqk,bkh->bqh", out, vp)


def _run_case(name, B, S, m_dim, h_dim, use_mask, apply_mask, compute_dtype, tol):
    key = jax.random.PRNGKey(0)
    kq, kk, kv_, kp = jax.random.split(key, 4)
    q = jax.random.normal(kq, (B, S, m_dim), jnp.float32)
    k = jax.random.normal(kk, (B, S, m_dim), jnp.float32)
    v = jax.random.normal(kv_, (B, S, m_dim), jnp.float32)
    mask = None
    if use_mask:
        keep = (jnp.arange(S)[None, :] < (3 * S) // 4).astype(jnp.float32)
        mask = jnp.repeat(keep, B, axis=0)
    params = init_params(kp, m_dim, h_dim)

    out = attention_forward(q, k, v, params, attention_mask=mask,
                            apply_mask=apply_mask, compute_dtype=compute_dtype)
    out = jax.block_until_ready(out)

    ref = _reference(q, k, v, params, mask, apply_mask)
    assert out.shape == ref.shape, f"{name}: shape {out.shape} vs {ref.shape}"
    err = float(jnp.max(jnp.abs(out - ref)))
    assert jnp.allclose(out, ref, atol=tol, rtol=tol), f"{name}: max abs err {err}"


if __name__ == "__main__":
    # f32 case checks exact math paths; bf16 cases (the performance default) use a looser
    # tolerance for mixed-precision MXU operands.
    _run_case("small_masked_f32", B=2, S=8, m_dim=32, h_dim=16,
              use_mask=True, apply_mask=True, compute_dtype=jnp.float32, tol=1e-2)
    _run_case("tiled_causal_bf16", B=2, S=384, m_dim=128, h_dim=128,
              use_mask=True, apply_mask=True, compute_dtype=jnp.bfloat16, tol=5e-2)
    _run_case("tiled_nomask_bf16", B=2, S=256, m_dim=128, h_dim=128,
              use_mask=False, apply_mask=False, compute_dtype=jnp.bfloat16, tol=5e-2)
    print("KERNEL_OK")
</pallas_src>

<mosaic_0001>
module attributes {stable_mosaic.version = 11 : i64} {
  func.func @_linear_kernel(%arg0: i32, %arg1: i32, %arg2: memref<1x8x32xf32, #tpu.memory_space<vmem>>, %arg3: memref<32x16xf32, #tpu.memory_space<vmem>>, %arg4: memref<1x16xf32, #tpu.memory_space<vmem>>, %arg5: memref<1x8x16xf32, #tpu.memory_space<vmem>>) attributes {dimension_semantics = [#tpu.dimension_semantics<parallel>, #tpu.dimension_semantics<parallel>], iteration_bounds = array<i64: 2, 1>, scalar_prefetch = 0 : i64, scratch_operands = 0 : i64, tpu.core_type = #tpu.core_type<tc>, window_params = [{transform_indices = @transform_0, window_bounds = array<i64: 1, 8, 32>}, {pipeline_mode = #tpu.pipeline_mode<synchronous>, transform_indices = @transform_1, window_bounds = array<i64: 32, 16>}, {pipeline_mode = #tpu.pipeline_mode<synchronous>, transform_indices = @transform_2, window_bounds = array<i64: 1, 16>}, {transform_indices = @transform_3, window_bounds = array<i64: 1, 8, 16>}]} {
    %c0 = arith.constant 0 : index
    %c0_0 = arith.constant 0 : index
    %c0_1 = arith.constant 0 : index
    %0 = vector.load %arg2[%c0, %c0_0, %c0_1] : memref<1x8x32xf32, #tpu.memory_space<vmem>>, vector<1x8x32xf32>
    %1 = vector.shape_cast %0 : vector<1x8x32xf32> to vector<8x32xf32>
    %c0_2 = arith.constant 0 : index
    %c0_3 = arith.constant 0 : index
    %2 = vector.load %arg3[%c0_2, %c0_3] : memref<32x16xf32, #tpu.memory_space<vmem>>, vector<32x16xf32>
    %cst = arith.constant dense<0.000000e+00> : vector<8x16xf32>
    %3 = tpu.matmul %1, %2, %cst {dimension_numbers = #tpu.dot_dimension_numbers<[1], [0], [0], [1], [0, 0, 1, 1], [], []>} : vector<8x32xf32>, vector<32x16xf32>, vector<8x16xf32> -> vector<8x16xf32>
    %c0_4 = arith.constant 0 : index
    %c0_5 = arith.constant 0 : index
    %4 = vector.load %arg4[%c0_4, %c0_5] : memref<1x16xf32, #tpu.memory_space<vmem>>, vector<1x16xf32>
    %5 = vector.broadcast %4 : vector<1x16xf32> to vector<8x16xf32>
    %6 = arith.addf %3, %5 : vector<8x16xf32>
    %c0_6 = arith.constant 0 : index
    %c0_7 = arith.constant 0 : index
    %c0_8 = arith.constant 0 : index
    %7 = vector.load %arg5[%c0_6, %c0_7, %c0_8] : memref<1x8x16xf32, #tpu.memory_space<vmem>>, vector<1x8x16xf32>
    %8 = vector.shape_cast %7 : vector<1x8x16xf32> to vector<8x16xf32>
    %9 = vector.shape_cast %6 : vector<8x16xf32> to vector<1x8x16xf32>
    tpu.vector_store %arg5[%c0_6, %c0_7, %c0_8], %9 {strides = array<i32>} : memref<1x8x16xf32, #tpu.memory_space<vmem>>, vector<1x8x16xf32>,
    return
  }
  func.func @transform_0(%arg0: i32, %arg1: i32) -> (i32, i32, i32) {
    %c0_i32 = arith.constant 0 : i32
    %c0_i32_0 = arith.constant 0 : i32
    return %arg0, %arg1, %c0_i32 : i32, i32, i32
  }
  func.func @transform_1(%arg0: i32, %arg1: i32) -> (i32, i32) {
    %c0_i32 = arith.constant 0 : i32
    %c0_i32_0 = arith.constant 0 : i32
    %c0_i32_1 = arith.constant 0 : i32
    return %c0_i32, %c0_i32_0 : i32, i32
  }
  func.func @transform_2(%arg0: i32, %arg1: i32) -> (i32, i32) {
    %c0_i32 = arith.constant 0 : i32
    %c0_i32_0 = arith.constant 0 : i32
    %c0_i32_1 = arith.constant 0 : i32
    return %c0_i32, %c0_i32_0 : i32, i32
  }
  func.func @transform_3(%arg0: i32, %arg1: i32) -> (i32, i32, i32) {
    %c0_i32 = arith.constant 0 : i32
    %c0_i32_0 = arith.constant 0 : i32
    return %arg0, %arg1, %c0_i32 : i32, i32, i32
  }
}

</mosaic_0001>

<bundles_post_ra>
// kernel: tpu_custom_call.1
= control target key start
LH: loop header
LB: loop body
LE: loop exit
PB: predicated region body
PF: predicated region fallthrough
CT: control target
= control target key end

     0   :  { %8 = vsyncpa [#allocation3], 0  ;;  %s594_s0 = inlined_call_operand.vmem [shape: f32[2,8,32], index: 0, kind: input, shape index: {}]   ;;  %s595_s1 = inlined_call_operand.vmem [shape: f32[32,16], index: 1, kind: input, shape index: {}]   ;;  %s596_s2 = inlined_call_operand.vmem [shape: f32[1,16], index: 2, kind: input, shape index: {}]   ;;  %s597_s3 = inlined_call_operand.hbm [shape: f32[2,8,16], index: 3, kind: output, shape index: {}]  }
   0x1   :  { %10 = vsyncpa [#allocation3 + $0x1], 0  ;;  %s482_s12 = smov 0   ;;  %s484_s13 = smov 0  }
   0x2   :  { %s486_s14 = smov 0   ;;  %s488_s15 = smov 0  }
   0x3   :  { %s490_s16 = smov 0   ;;  %s492_s17 = smov 0  }
   0x4 LB: > { %s314_s18 = sadd.s32 4294967295, %s460_s17   ;;  %s315_s19 = sadd.s32 4294967294, %s460_s17   ;;  %s460_s17 = sphi %s492_s17, %s16_s17   ;;  %s456_s16 = sphi %s490_s16, %s604_s16   ;;  %s452_s15 = sphi %s488_s15, %s603_s15   ;;  %s448_s14 = sphi %s486_s14, %s602_s14   ;;  %s444_s13 = sphi %s484_s13, %s601_s13   ;;  %s440_s12 = sphi %s482_s12, %s600_s12  }
   0x5   : > { %s28_s20 = sadd.s32 1, %s456_s16  ;;  %s107_s21 = sadd.s32 1, %s448_s14 }
   0x6   : > { %p30_p0 = scmp.ge.s32.totalorder %s28_s20, 2  ;;  %p117_p1 = scmp.ne.s32.totalorder %s448_s14, %s444_s13 }
   0x7   : > { %p118_p2 = scmp.eq.s32.totalorder %s314_s18, 1  ;;  %p123_p3 = scmp.ne.s32.totalorder %s444_s13, %s440_s12 }
   0x8   : > { %s606_s20 = smov (%p30_p0, %s28_s20), 0  ;;  %p124_p5 = scmp.eq.s32.totalorder %s315_s19, 1 }
   0x9   : > { %p522_p4 = por %p118_p2, %p117_p1  ;;  %s102_s23 = ssub.s32 %s456_s16, %s606_s20 }
   0xa   : > { %p318_p6 = scmp.ge.s32.totalorder %s460_s17, 1  ;;  %p105_p7 = scmp.eq.s32.totalorder %s102_s23, 0 }
   0xb   : > { %p529_p8 = por %p124_p5, %p123_p3  ;;  %p158_p9 = scmp.lt.s32.totalorder %s460_s17, 3 }
   0xc   : > { %s535_s25 = scalar_select %p105_p7, %s448_s14, %s107_s21  }
   0xd   : > { %p159_p10 = pnand %p318_p6, %p158_p9 }
   0xe   : > { %p184_p11 = scmp.lt.s32.totalorder (!%p159_p10), %s452_s15, 1  ;;  %s181_s18 = sand.u32 (!%p159_p10), 1, %s444_s13  }
   0xf   : > { %162 = sbr.rel (%p159_p10) target bundleno = 159 (0x9f), region = 32  ;;  %s319_s19 = sshll.u32 (!%p159_p10), %s181_s18, 3 }
  0x10   : > { %s323_s21 = sshll.u32 (!%p159_p10), %s452_s15, 3  ;;  %s183_s30 = scalar_lea.vmem (!%p159_p10), [#allocation2], %s319_s19 }
  0x11   : > { %s238_s27 = scalar_lea.hbm (!%p159_p10), %s597_s3, %s323_s21  ;;  %s240_s4 = sshll.u32 (!%p159_p10), %s183_s30, 4  ;;  %s241_s4 = int_to_ptr.vmem [resolvable:$true] %s240_s4 }
  0x12   : > { %s227_s6 = scalar_lea.sflag (!%p159_p10), [#allocation3], %s181_s18  ;;  %s402_s10 = scalar_lea.hbm (!%p159_p10), %s597_s3, 16 }
  0x14   : > { %v195_v0 = vld [vmem:[%s595_s1 + $0x18] sm:$0xff]  ;;  %v194_v1 = vld [vmem:[%s595_s1 + $0x10] sm:$0xff]  ;;  %v193_v2 = vld [vmem:[%s595_s1 + $0x8] sm:$0xff]  ;;  %s185_s5 = scalar_select %p184_p11, %s452_s15, 1  ;;  %vm200_vm0 = vcmask 261120   ;;  %vm224_vm1 = vcmask 130048  }
  0x15   : > { %216 = vmatpush.msra.mxu0 %v195_v0  ;;  %v192_v3 = vld [vmem:[%s595_s1] sm:$0xff] }
  0x16   : > { %s320_s8 = sshll.u32 %s185_s5, 3  ;;  %v381_v5 = vld [vmem:[%s596_s2] ss:$0 sm:$0xff]  ;;  %s242_s5 = sshll.u32 %s238_s27, 4  ;;  %s243_s5 = int_to_ptr.hbm [resolvable:$true] %s242_s5 }
  0x17   : > { %217 = vmatpush.msra.mxu0 %v194_v1  ;;  %s190_s11 = scalar_lea.vmem %s594_s0, %s320_s8  ;;  %s396_s15 = sshra.s32 %s243_s5, 4  ;;  %s397_s15 = int_to_ptr.hbm [resolvable:$true] %s396_s15 }
  0x18   : > { %v191_v4 = vld [vmem:[%s190_s11] sm:$0xff]  ;;  %s398_s7 = scalar_lea.hbm %s397_s15, 8  ;;  %p403_p1 = scmp.lt.s32.totalorder %s397_s15, %s597_s3 }
  0x19   : > { %218 = vmatpush.msra.mxu0 %v193_v2  ;;  %p399_p12 = scmp.ne.s32.totalorder %s397_s15, %s398_s7  ;;  %p404_p2 = scmp.lt.s32.totalorder %s402_s10, %s398_s7 }
  0x1b   : > { %219 = vmatpush.msra.mxu0 %v192_v3  ;;  %p400_p13 = pnand %p399_p12, %p522_p4  ;;  %p405_p3 = por %p404_p2, %p403_p1 }
  0x1c   : > { %321 = vmatmul.msk.f32.vlgmr.msra.gmra.mxu0 %vm200_vm0, %v191_v4 }
  0x1d   : > { %p401_p0 = pneg %p400_p13 }
  0x1f   : > { %p406_p5 = pnand %p405_p3, %p401_p0 }
  0x99   : > { %v221_v6 = vpop.f32.mrf.mxu0 }
  0x9a   : > { %v222_v7 = vadd.f32 %v381_v5, %v221_v6 }
  0x9c   : > { %225 = vst.msk [vmem:[%s183_s30] sm:$0xff] %vm224_vm1, %v222_v7 }
  0x9d   : > { %409 = shalt.err (!%p406_p5)
}
  0x9e   : > { %326 = dma.vmem_to_hbm [thread:$0]  (%p522_p4), %s241_s4, 128, %s243_s5, %s227_s6  }
  0x9f PF: > { %p332_p6 = scmp.ge.s32.totalorder %s460_s17, 2  ;;  %s254_s18 = sand.u32 1, %s440_s12  }
  0xa0   : > { %s255_s21 = scalar_lea.sflag [#allocation3], %s254_s18 }
  0xa1   : > { %p329_p7 = pnand %p332_p6, %p529_p8 }
  0xa3   : > { %p330_p9 = pneg %p329_p7 }
  0xa5   : > { %435 = dma.done.wait (%p330_p9), %s255_s21, 128  }
  0xa6   : > { %437 = vsyncadd (%p330_p9), %s255_s21, 4294967168  ;;  %s16_s17 = sadd.s32 1, %s460_s17   ;;  %s600_s12 = smov %s444_s13 }
  0xa7   : > { %p13_p10 = scmp.ge.s32.totalorder %s16_s17, 4   ;;  %s601_s13 = smov %s448_s14 }
  0xa8   : > { %s602_s14 = smov %s535_s25  ;;  %s603_s15 = smov %s456_s16 }
  0xa9   : > { %s604_s16 = smov %s606_s20  ;;  %15 = sbr.rel (!%p13_p10) target bundleno = 4 (0x4), region = 67 }
  0xae   :  { %261 = vsyncpa [#allocation3], 1 }
  0xaf   :  { %263 = vsyncpa [#allocation3 + $0x1], 1 }

</bundles_post_ra>
